<compile_context>
chip_gen: v6e
topology: v6e:2x2x1
jax: 0.10.0
libtpu: 0.0.40
codegen_flags: <defaults>
</compile_context>

<pallas_src>
import functools

import jax
import jax.numpy as jnp
from jax.experimental import pallas as pl
from jax.experimental.pallas import tpu as pltpu


def _round_up(x, m):
    return ((x + m - 1) // m) * m


def _vmem_capacity_bytes():
    """Query physical VMEM; fall back to the smallest (v7x, 64 MiB) if unknown."""
    try:
        info = pltpu.get_tpu_info()
        cap = getattr(info, "vmem_capacity_bytes", None)
        if cap:
            return int(cap)
    except Exception:
        pass
    return 64 * 1024 * 1024


def _choose_row_tile(n, f_out_p, n_adj, adj_itemsize):
    """Row tile budgeted against the full VMEM picture (not just adjacency)."""
    cap = _vmem_capacity_bytes()
    limit = min(int(cap * 0.7), 100 * 1024 * 1024)          # ~45 MiB v7x, ~90 MiB v5e/v6e
    # Resident per-batch hidden (double-buffered bf16) + bias + slack.
    fixed = 2 * n * f_out_p * 2 + 2 * f_out_p * 4 + (1 << 18)
    # Per-row cost: double-buffered adjacency tiles + double-buffered f32 output tile.
    per_row = n_adj * 2 * n * adj_itemsize + 2 * f_out_p * 4
    avail = max(limit - fixed, per_row * 128)
    tn = avail // per_row
    if tn >= n:
        return n, limit
    tn = max(128, (tn // 128) * 128)                        # MXU-friendly multiple of 128
    tn = min(tn, 2048)
    return int(tn), limit


def _gcn_kernel(hidden_ref, dep_ref, *rest,
                lambda_p, use_activation, use_latent, f_out, fuse_sum):
    if use_latent:
        lat_ref, bias_ref, out_ref = rest
    else:
        lat_ref = None
        bias_ref, out_ref = rest

    hidden = hidden_ref[0]            # (N, F_out_p) bf16  (ones column at f_out if fuse_sum)
    bias = bias_ref[...]              # (1, F_out_p) f32, broadcasts over rows

    def branch(adj_ref):
        adj_raw = adj_ref[0]                              # (TN, N) caller dtype (single HBM read)
        adj = adj_raw.astype(jnp.bfloat16)                # cast on VPU, hidden under DMA
        num = jnp.dot(adj, hidden, preferred_element_type=jnp.float32)
        if fuse_sum:
            # Row sum fused into the MXU matmul via the 1.0 padding column of hidden.
            denom = num[:, f_out:f_out + 1] + 1.0
        else:
            denom = jnp.sum(adj_raw.astype(jnp.float32), axis=1, keepdims=True) + 1.0
        return num * pl.reciprocal(denom) + bias          # exact reciprocal, (TN,1) column

    dep_out = branch(dep_ref)
    final = dep_out
    if use_latent:
        lat_out = branch(lat_ref)
        gate = (1.0 - lambda_p) * jax.nn.sigmoid(lat_out)
        final = dep_out + gate * (lat_out - dep_out)
    if use_activation:
        final = jnp.maximum(final, 0.0)

    out_ref[0] = final.astype(out_ref.dtype)


def dual_graph_convolution(text, dep_adj, latent_adj, weight, bias,
                           *, lambda_p=0.8, use_activation=True, row_tile=None):
    """Pallas implementation of DualGraphConvolution.forward."""
    B, N, F_in = text.shape
    F_out = weight.shape[-1]
    use_latent = (latent_adj is not None) and (float(lambda_p) < 1.0)

    # Lane-dense output columns; the padding also hosts the fused row-sum column.
    f_out_p = _round_up(max(F_out, 1), 128)
    fuse_sum = f_out_p > F_out

    # hidden = text @ W  : O(B*N*F_in*F_out) flops, tiny vs. the B*N^2 adjacency
    # streaming; computed once here so both grid axes can be "parallel" and the
    # kernel has no per-batch preamble / persistent scratch.
    hidden = jnp.einsum("bnf,fo->bno",
                        text.astype(jnp.float32), weight.astype(jnp.float32))
    pad_cols = f_out_p - F_out
    if pad_cols > 0:
        ones_col = jnp.ones((B, N, 1), hidden.dtype)       # fused row-sum column
        parts = [hidden, ones_col]
        if pad_cols > 1:
            parts.append(jnp.zeros((B, N, pad_cols - 1), hidden.dtype))
        hidden = jnp.concatenate(parts, axis=-1)
    hidden = hidden.astype(jnp.bfloat16)                   # (B, N, f_out_p)

    if bias is None:
        bias2d = jnp.zeros((1, f_out_p), jnp.float32)
    else:
        bias2d = jnp.reshape(bias, (1, F_out)).astype(jnp.float32)
        if pad_cols > 0:
            bias2d = jnp.pad(bias2d, ((0, 0), (0, pad_cols)))

    # Adjacency streamed AS-IS: no wrapper cast, no padding -> exactly one HBM
    # read per element at the caller's dtype width.
    n_adj = 2 if use_latent else 1
    adj_itemsize = jnp.dtype(dep_adj.dtype).itemsize
    if row_tile is not None:
        tn = N if row_tile >= N else min(N, _round_up(row_tile, 128))
        vmem_limit = min(int(_vmem_capacity_bytes() * 0.7), 100 * 1024 * 1024)
    else:
        tn, vmem_limit = _choose_row_tile(N, f_out_p, n_adj, adj_itemsize)
    tn = min(tn, N)
    n_row_tiles = pl.cdiv(N, tn)                            # partial last tile is fine

    in_arrays = [hidden, dep_adj]
    in_specs = [
        pl.BlockSpec((1, N, f_out_p), lambda b, r: (b, 0, 0)),   # resident per batch item
        pl.BlockSpec((1, tn, N), lambda b, r: (b, r, 0)),        # row tile of dep_adj
    ]
    if use_latent:
        in_arrays.append(latent_adj)
        in_specs.append(pl.BlockSpec((1, tn, N), lambda b, r: (b, r, 0)))
    in_arrays.append(bias2d)
    in_specs.append(pl.BlockSpec((1, f_out_p), lambda b, r: (0, 0)))

    kernel = functools.partial(
        _gcn_kernel,
        lambda_p=float(lambda_p),
        use_activation=bool(use_activation),
        use_latent=use_latent,
        f_out=int(F_out),
        fuse_sum=fuse_sum,
    )

    out = pl.pallas_call(
        kernel,
        out_shape=jax.ShapeDtypeStruct((B, N, f_out_p), jnp.float32),
        grid=(B, n_row_tiles),
        in_specs=in_specs,
        out_specs=pl.BlockSpec((1, tn, f_out_p), lambda b, r: (b, r, 0)),
        compiler_params=pltpu.CompilerParams(
            dimension_semantics=("parallel", "parallel"),
            vmem_limit_bytes=int(vmem_limit),
        ),
    )(*in_arrays)

    if f_out_p != F_out:
        out = out[:, :, :F_out]
    return out


def _reference(text, dep_adj, latent_adj, weight, bias,
               lambda_p=0.8, use_activation=True):
    hidden = jnp.einsum("bnf,fo->bno", text, weight)
    denom = jnp.sum(dep_adj, axis=2, keepdims=True) + 1.0
    dep_out = jnp.einsum("bnm,bmo->bno", dep_adj, hidden) / denom
    if bias is not None:
        dep_out = dep_out + bias
    final = dep_out
    if latent_adj is not None and lambda_p < 1.0:
        denom = jnp.sum(latent_adj, axis=2, keepdims=True) + 1.0
        lat_out = jnp.einsum("bnm,bmo->bno", latent_adj, hidden) / denom
        if bias is not None:
            lat_out = lat_out + bias
        gate = (1.0 - lambda_p) * jax.nn.sigmoid(lat_out)
        final = (1.0 - gate) * dep_out + gate * lat_out
    if use_activation:
        final = jnp.maximum(final, 0.0)
    return final


if __name__ == "__main__":
    key = jax.random.PRNGKey(0)
    k_text, k_dep, k_lat, k_w, k_b = jax.random.split(key, 5)

    B, N = 2, 16            # batch, number of graph nodes (sequence length)
    F_in, F_out = 32, 32    # in_features, out_features
    lambda_p = 0.8

    text = jax.random.normal(k_text, (B, N, F_in), dtype=jnp.float32)
    dep_adj = (jax.random.uniform(k_dep, (B, N, N)) > 0.7).astype(jnp.float32)
    latent_adj = jax.random.uniform(k_lat, (B, N, N), dtype=jnp.float32)

    weight = jax.random.normal(k_w, (F_in, F_out), dtype=jnp.float32) * 0.1
    bias = jax.random.normal(k_b, (F_out,), dtype=jnp.float32) * 0.1

    # Tolerance relaxed vs. the f32 reference: the adjacency/hidden matmuls run
    # in bf16 with f32 MXU accumulation (binary dep_adj is exact in bf16;
    # latent_adj loses ~3 decimal digits, which the sigmoid gate damps).
    tol = dict(atol=2e-2, rtol=2e-2)

    # Dual-branch (latent) path.
    out = dual_graph_convolution(text, dep_adj, latent_adj, weight, bias,
                                 lambda_p=lambda_p, use_activation=True)
    out = jax.block_until_ready(out)
    ref = _reference(text, dep_adj, latent_adj, weight, bias,
                     lambda_p=lambda_p, use_activation=True)
    assert out.shape == (B, N, F_out)
    assert jnp.allclose(out, ref, **tol)

    # Dependency-only path (latent branch compiled out, no latent DMA at all).
    out2 = dual_graph_convolution(text, dep_adj, None, weight, bias,
                                  lambda_p=lambda_p, use_activation=False)
    out2 = jax.block_until_ready(out2)
    ref2 = _reference(text, dep_adj, None, weight, bias,
                      lambda_p=lambda_p, use_activation=False)
    assert out2.shape == (B, N, F_out)
    assert jnp.allclose(out2, ref2, **tol)

    print("KERNEL_OK")
</pallas_src>

<mosaic_0001>
module attributes {stable_mosaic.version = 11 : i64} {
  func.func @_gcn_kernel(%arg0: i32, %arg1: i32, %arg2: memref<1x16x128xbf16, #tpu.memory_space<vmem>>, %arg3: memref<1x16x16xf32, #tpu.memory_space<vmem>>, %arg4: memref<1x16x16xf32, #tpu.memory_space<vmem>>, %arg5: memref<1x128xf32, #tpu.memory_space<vmem>>, %arg6: memref<1x16x128xf32, #tpu.memory_space<vmem>>) attributes {dimension_semantics = [#tpu.dimension_semantics<parallel>, #tpu.dimension_semantics<parallel>], iteration_bounds = array<i64: 2, 1>, scalar_prefetch = 0 : i64, scratch_operands = 0 : i64, tpu.core_type = #tpu.core_type<tc>, window_params = [{transform_indices = @transform_0, window_bounds = array<i64: 1, 16, 128>}, {transform_indices = @transform_1, window_bounds = array<i64: 1, 16, 16>}, {transform_indices = @transform_2, window_bounds = array<i64: 1, 16, 16>}, {pipeline_mode = #tpu.pipeline_mode<synchronous>, transform_indices = @transform_3, window_bounds = array<i64: 1, 128>}, {transform_indices = @transform_4, window_bounds = array<i64: 1, 16, 128>}]} {
    %c0 = arith.constant 0 : index
    %c0_0 = arith.constant 0 : index
    %c0_1 = arith.constant 0 : index
    %0 = vector.load %arg2[%c0, %c0_0, %c0_1] : memref<1x16x128xbf16, #tpu.memory_space<vmem>>, vector<1x16x128xbf16>
    %1 = vector.shape_cast %0 : vector<1x16x128xbf16> to vector<16x128xbf16>
    %c0_2 = arith.constant 0 : index
    %c0_3 = arith.constant 0 : index
    %2 = vector.load %arg5[%c0_2, %c0_3] : memref<1x128xf32, #tpu.memory_space<vmem>>, vector<1x128xf32>
    %c0_4 = arith.constant 0 : index
    %c0_5 = arith.constant 0 : index
    %c0_6 = arith.constant 0 : index
    %3 = vector.load %arg3[%c0_4, %c0_5, %c0_6] : memref<1x16x16xf32, #tpu.memory_space<vmem>>, vector<1x16x16xf32>
    %4 = vector.shape_cast %3 : vector<1x16x16xf32> to vector<16x16xf32>
    %5 = arith.truncf %4 : vector<16x16xf32> to vector<16x16xbf16>
    %cst = arith.constant dense<0.000000e+00> : vector<16x128xf32>
    %6 = tpu.matmul %5, %1, %cst {dimension_numbers = #tpu.dot_dimension_numbers<[1], [0], [0], [1], [0, 0, 1, 1], [], []>} : vector<16x16xbf16>, vector<16x128xbf16>, vector<16x128xf32> -> vector<16x128xf32>
    %7 = vector.extract_strided_slice %6 {offsets = [0, 32], sizes = [16, 1], strides = [1, 1]} : vector<16x128xf32> to vector<16x1xf32>
    %cst_7 = arith.constant 1.000000e+00 : f32
    %8 = vector.broadcast %cst_7 : f32 to vector<16x1xf32>
    %9 = arith.addf %7, %8 : vector<16x1xf32>
    %10 = tpu.reciprocal %9 : vector<16x1xf32> -> vector<16x1xf32>
    %11 = vector.broadcast %10 : vector<16x1xf32> to vector<16x128xf32>
    %12 = arith.mulf %6, %11 : vector<16x128xf32>
    %13 = vector.broadcast %2 : vector<1x128xf32> to vector<16x128xf32>
    %14 = arith.addf %12, %13 : vector<16x128xf32>
    %c0_8 = arith.constant 0 : index
    %c0_9 = arith.constant 0 : index
    %c0_10 = arith.constant 0 : index
    %15 = vector.load %arg4[%c0_8, %c0_9, %c0_10] : memref<1x16x16xf32, #tpu.memory_space<vmem>>, vector<1x16x16xf32>
    %16 = vector.shape_cast %15 : vector<1x16x16xf32> to vector<16x16xf32>
    %17 = arith.truncf %16 : vector<16x16xf32> to vector<16x16xbf16>
    %cst_11 = arith.constant dense<0.000000e+00> : vector<16x128xf32>
    %18 = tpu.matmul %17, %1, %cst_11 {dimension_numbers = #tpu.dot_dimension_numbers<[1], [0], [0], [1], [0, 0, 1, 1], [], []>} : vector<16x16xbf16>, vector<16x128xbf16>, vector<16x128xf32> -> vector<16x128xf32>
    %19 = vector.extract_strided_slice %18 {offsets = [0, 32], sizes = [16, 1], strides = [1, 1]} : vector<16x128xf32> to vector<16x1xf32>
    %cst_12 = arith.constant 1.000000e+00 : f32
    %20 = vector.broadcast %cst_12 : f32 to vector<16x1xf32>
    %21 = arith.addf %19, %20 : vector<16x1xf32>
    %22 = tpu.reciprocal %21 : vector<16x1xf32> -> vector<16x1xf32>
    %23 = vector.broadcast %22 : vector<16x1xf32> to vector<16x128xf32>
    %24 = arith.mulf %18, %23 : vector<16x128xf32>
    %25 = vector.broadcast %2 : vector<1x128xf32> to vector<16x128xf32>
    %26 = arith.addf %24, %25 : vector<16x128xf32>
    %27 = arith.negf %26 : vector<16x128xf32>
    %28 = math.exp %27 : vector<16x128xf32>
    %cst_13 = arith.constant 1.000000e+00 : f32
    %29 = vector.broadcast %cst_13 : f32 to vector<16x128xf32>
    %30 = arith.addf %29, %28 : vector<16x128xf32>
    %31 = arith.divf %29, %30 : vector<16x128xf32>
    %cst_14 = arith.constant 2.000000e-01 : f32
    %32 = vector.broadcast %cst_14 : f32 to vector<16x128xf32>
    %33 = arith.mulf %32, %31 : vector<16x128xf32>
    %34 = arith.subf %26, %14 : vector<16x128xf32>
    %35 = arith.mulf %33, %34 : vector<16x128xf32>
    %36 = arith.addf %14, %35 : vector<16x128xf32>
    %cst_15 = arith.constant 0.000000e+00 : f32
    %37 = vector.broadcast %cst_15 : f32 to vector<16x128xf32>
    %38 = arith.maximumf %36, %37 : vector<16x128xf32>
    %c0_16 = arith.constant 0 : index
    %c0_17 = arith.constant 0 : index
    %c0_18 = arith.constant 0 : index
    %39 = vector.load %arg6[%c0_16, %c0_17, %c0_18] : memref<1x16x128xf32, #tpu.memory_space<vmem>>, vector<1x16x128xf32>
    %40 = vector.shape_cast %39 : vector<1x16x128xf32> to vector<16x128xf32>
    %41 = vector.shape_cast %38 : vector<16x128xf32> to vector<1x16x128xf32>
    tpu.vector_store %arg6[%c0_16, %c0_17, %c0_18], %41 {strides = array<i32>} : memref<1x16x128xf32, #tpu.memory_space<vmem>>, vector<1x16x128xf32>,
    return
  }
  func.func @transform_0(%arg0: i32, %arg1: i32) -> (i32, i32, i32) {
    %c0_i32 = arith.constant 0 : i32
    %c0_i32_0 = arith.constant 0 : i32
    %c0_i32_1 = arith.constant 0 : i32
    return %arg0, %c0_i32, %c0_i32_0 : i32, i32, i32
  }
  func.func @transform_1(%arg0: i32, %arg1: i32) -> (i32, i32, i32) {
    %c0_i32 = arith.constant 0 : i32
    %c0_i32_0 = arith.constant 0 : i32
    return %arg0, %arg1, %c0_i32 : i32, i32, i32
  }
  func.func @transform_2(%arg0: i32, %arg1: i32) -> (i32, i32, i32) {
    %c0_i32 = arith.constant 0 : i32
    %c0_i32_0 = arith.constant 0 : i32
    return %arg0, %arg1, %c0_i32 : i32, i32, i32
  }
  func.func @transform_3(%arg0: i32, %arg1: i32) -> (i32, i32) {
    %c0_i32 = arith.constant 0 : i32
    %c0_i32_0 = arith.constant 0 : i32
    %c0_i32_1 = arith.constant 0 : i32
    return %c0_i32, %c0_i32_0 : i32, i32
  }
  func.func @transform_4(%arg0: i32, %arg1: i32) -> (i32, i32, i32) {
    %c0_i32 = arith.constant 0 : i32
    %c0_i32_0 = arith.constant 0 : i32
    return %arg0, %arg1, %c0_i32 : i32, i32, i32
  }
}

</mosaic_0001>

<bundles_post_ra>
// kernel: tpu_custom_call.1
= control target key start
LH: loop header
LB: loop body
LE: loop exit
PB: predicated region body
PF: predicated region fallthrough
CT: control target
= control target key end

     0   :  { %s1212_s0 = inlined_call_operand.hbm [shape: bf16[2,16,128], index: 0, kind: input, shape index: {}]   ;;  %s1213_s1 = inlined_call_operand.hbm [shape: f32[2,16,16], index: 1, kind: input, shape index: {}]   ;;  %s1214_s2 = inlined_call_operand.hbm [shape: f32[2,16,16], index: 2, kind: input, shape index: {}]   ;;  %s1215_s3 = inlined_call_operand.vmem [shape: f32[1,128], index: 3, kind: input, shape index: {}]   ;;  %s1216_s4 = inlined_call_operand.hbm [shape: f32[2,16,128], index: 4, kind: output, shape index: {}]  }
   0x1   :  { %1220 = sst [smem:[#allocation14_spill]] %s1213_s1 }
   0x2   :  { %1221 = sst [smem:[#allocation15_spill]] %s1214_s2 }
   0x3   :  { %9 = vsyncpa [#allocation3], 0 }
   0x4   :  { %11 = vsyncpa [#allocation3 + $0x1], 0 }
   0x5   :  { %12 = vsyncpa [#allocation6], 0 }
   0x6   :  { %14 = vsyncpa [#allocation6 + $0x1], 0 }
   0x7   :  { %15 = vsyncpa [#allocation4], 0 }
   0x8   :  { %17 = vsyncpa [#allocation4 + $0x1], 0  ;;  %s995_s15 = smov 0   ;;  %s997_s16 = smov 0  }
   0x9   :  { %s999_s17 = smov 0   ;;  %s1001_s18 = smov 0  }
   0xa   :  { %s1003_s19 = smov 0   ;;  %s1005_s20 = smov 0  }
   0xb LB: > { %s1026_s21 = sadd.s32 4294967295, %s955_s20   ;;  %s639_s22 = sadd.s32 4294967294, %s955_s20   ;;  %s955_s20 = sphi %s1005_s20, %s23_s20   ;;  %s951_s19 = sphi %s1003_s19, %s1241_s19   ;;  %s947_s18 = sphi %s1001_s18, %s1240_s18   ;;  %s943_s17 = sphi %s999_s17, %s1239_s17   ;;  %s939_s16 = sphi %s997_s16, %s1238_s16   ;;  %s935_s15 = sphi %s995_s15, %s1237_s15  }
   0xc   : > { %s35_s23 = sadd.s32 1, %s951_s19  ;;  %s42_s24 = sadd.s32 1, %s943_s17 }
   0xd   : > { %p37_p0 = scmp.ge.s32.totalorder %s35_s23, 2  ;;  %p49_p1 = scmp.ne.s32.totalorder %s943_s17, %s939_s16 }
   0xe   : > { %p50_p2 = scmp.eq.s32.totalorder %s955_s20, 0  ;;  %p55_p3 = scmp.ne.s32.totalorder %s939_s16, %s935_s15 }
   0xf   : > { %s1243_s23 = smov (%p37_p0, %s35_s23), 0  ;;  %p56_p5 = scmp.eq.s32.totalorder %s1026_s21, 0 }
  0x10   : > { %1222 = sst [smem:[#allocation12_spill]] %s1243_s23  ;;  %p1038_p4 = por %p50_p2, %p49_p1 }
  0x11   : > { %s39_s26 = ssub.s32 %s951_s19, %s1243_s23  ;;  %p158_p6 = scmp.eq.s32.totalorder %s1026_s21, 1 }
  0x12   : > { %p40_p7 = scmp.eq.s32.totalorder %s39_s26, 0  ;;  %p1046_p8 = por %p56_p5, %p55_p3 }
  0x13   : > { %p1050_p9 = por %p158_p6, %p49_p1  ;;  %p164_p10 = scmp.eq.s32.totalorder %s639_s22, 1 }
  0x14   : > { %s1055_s29 = scalar_select %p40_p7, %s943_s17, %s42_s24  }
  0x15   : > { %p1057_p11 = por %p164_p10, %p55_p3  ;;  %p709_p13 = scmp.lt.s32.totalorder %s955_s20, 2 }
  0x16   : > { %1226 = sst [smem:[#allocation13_spill]] %s1055_s29  ;;  %s1064_s5 = sand.u32 1, %s943_s17  }
  0x17   : > { %s208_s6 = sand.u32 1, %s955_s20   ;;  %s645_s7 = sshll.u32 %s1064_s5, 4 }
  0x18   : > { %p1070_p0 = pnand %p709_p13, %p1038_p4  ;;  %s668_s9 = sshll.u32 %s951_s19, 8 }
  0x19   : > { %s1229_s1 = sld [smem:[#allocation14_spill]]  ;;  %s212_s13 = scalar_lea.vmem [#allocation5], %s645_s7 }
  0x1a   : > { %s221_s14 = sshll.u32 %s212_s13, 4  ;;  %s1080_s22 = scalar_lea.sflag [#allocation6], %s208_s6  ;;  %s222_s14 = int_to_ptr.vmem [resolvable:$true] %s221_s14 }
  0x1b   : > { %p789_p1 = pneg %p1070_p0  ;;  %s800_s24 = scalar_lea.vmem %s222_s14, 256 }
  0x1c   : > { %p801_p2 = scmp.ne.s32.totalorder %s222_s14, %s800_s24  ;;  %s957_s25 = smov [#allocation5]  }
  0x1d   : > { %s805_s26 = sshll.u32 %s957_s25, 4  ;;  %s806_s26 = int_to_ptr.vmem [resolvable:$false] %s805_s26 }
  0x1e   : > { %p803_p3 = pnand %p801_p2, %p789_p1  ;;  %s807_s23 = scalar_lea.vmem %s806_s26, 512 }
  0x1f   : > { %s220_s12 = scalar_lea.hbm %s1229_s1, %s668_s9  ;;  %p808_p5 = scmp.lt.s32.totalorder %s222_s14, %s806_s26 }
  0x20   : > { %p804_p4 = pneg %p803_p3  ;;  %p809_p6 = scmp.lt.s32.totalorder %s807_s23, %s800_s24 }
  0x22   : > { %p810_p7 = por %p809_p6, %p808_p5 }
  0x24   : > { %p811_p10 = pnand %p810_p7, %p804_p4 }
  0x26   : > { %814 = shalt.err (!%p811_p10)
}
  0x27   : > { %s1218_s10 = smov 128   ;;  %s1219_s6 = smov 8  }
  0x28   : > { %701 = dma.hbm_to_vmem [thread:$0]  (!%p1070_p0), %s220_s12, 256, %s222_s14, %s1080_s22, %s1218_s10, %s1218_s10, %s1219_s6  }
  0x29   : > { %s1230_s2 = sld [smem:[#allocation15_spill]]  ;;  %s235_s24 = scalar_lea.vmem [#allocation7], %s645_s7 }
  0x2a   : > { %s244_s25 = sshll.u32 %s235_s24, 4  ;;  %p651_p13 = scmp.ge.s32.totalorder %s955_s20, 1  ;;  %s1101_s25 = int_to_ptr.vmem [resolvable:$true] %s244_s25 }
  0x2b   : > { %p252_p2 = scmp.lt.s32.totalorder %s955_s20, 3  ;;  %s642_s1 = sshll.u32 %s1064_s5, 3 }
  0x2c   : > { %s667_s29 = sshll.u32 %s951_s19, 7  ;;  %s188_s10 = scalar_lea.sflag [#allocation3], %s1064_s5 }
  0x2d   : > { %p1104_p3 = pnand %p651_p13, %p252_p2  ;;  %s197_s11 = scalar_lea.hbm %s1212_s0, %s667_s29 }
  0x2e   : > { %s960_s24 = smov [#allocation2]  }
  0x2f   : > { %s1096_s13 = scalar_lea.hbm %s1230_s2, %s668_s9  ;;  %s191_s9 = scalar_lea.vmem [#allocation2], %s642_s1 }
  0x30   : > { %s198_s23 = sshll.u32 %s191_s9, 4  ;;  %s833_s6 = sshll.u32 %s960_s24, 4  ;;  %s199_s23 = int_to_ptr.vmem [resolvable:$true] %s198_s23  ;;  %s834_s6 = int_to_ptr.vmem [resolvable:$false] %s833_s6 }
  0x31   : > { %s828_s7 = scalar_lea.vmem %s199_s23, 128  ;;  %s835_s2 = scalar_lea.vmem %s834_s6, 256 }
  0x32   : > { %p829_p4 = scmp.ne.s32.totalorder %s199_s23, %s828_s7  ;;  %p836_p7 = scmp.lt.s32.totalorder %s199_s23, %s834_s6 }
  0x33   : > { %p837_p10 = scmp.lt.s32.totalorder %s835_s2, %s828_s7 }
  0x34   : > { %p831_p5 = pnand %p829_p4, %p789_p1 }
  0x35   : > { %p838_p13 = por %p837_p10, %p836_p7 }
  0x36   : > { %p832_p6 = pneg %p831_p5 }
  0x38   : > { %p839_p2 = pnand %p838_p13, %p832_p6 }
  0x3a   : > { %842 = shalt.err (!%p839_p2)
}
  0x3b   : > { %s961_s29 = smov 64   ;;  %s962_s1 = smov 4  }
  0x3c   : > { %698 = dma.hbm_to_vmem [thread:$0]  (!%p1070_p0), %s197_s11, 128, %s199_s23, %s188_s10, %s961_s29, %s961_s29, %s962_s1  }
  0x3d   : > { %s856_s5 = scalar_lea.vmem %s1101_s25, 256  ;;  %s963_s6 = smov [#allocation7]  }
  0x3e   : > { %p857_p4 = scmp.ne.s32.totalorder %s1101_s25, %s856_s5  ;;  %s861_s2 = sshll.u32 %s963_s6, 4  ;;  %s862_s2 = int_to_ptr.vmem [resolvable:$false] %s861_s2 }
  0x3f   : > { %s863_s12 = scalar_lea.vmem %s862_s2, 512  ;;  %p864_p6 = scmp.lt.s32.totalorder %s1101_s25, %s862_s2 }
  0x40   : > { %p859_p5 = pnand %p857_p4, %p789_p1  ;;  %p865_p7 = scmp.lt.s32.totalorder %s863_s12, %s856_s5 }
  0x42   : > { %p860_p12 = pneg %p859_p5  ;;  %p866_p10 = por %p865_p7, %p864_p6 }
  0x44   : > { %p867_p13 = pnand %p866_p10, %p860_p12 }
  0x46   : > { %870 = shalt.err (!%p867_p13)
}
  0x47   : > { %s1232_s14 = smov 8   ;;  %s1233_s9 = smov 128  }
  0x48   : > { %704 = dma.hbm_to_vmem [thread:$0]  (!%p1070_p0), %s1096_s13, 256, %s1101_s25, %s1080_s22, %s1233_s9, %s1233_s9, %s1232_s14  }
  0x49   : > { %256 = sbr.rel (%p1104_p3) target bundleno = 484 (0x1e4), region = 36  ;;  %s1136_s10 = sand.u32 (!%p1104_p3), 1, %s939_s16  }
  0x4a   : > { %s652_s11 = sshll.u32 (!%p1104_p3), %s1136_s10, 3  ;;  %s259_s23 = scalar_lea.sflag (!%p1104_p3), [#allocation3], %s1136_s10 }
  0x4b   : > { %s262_s7 = scalar_lea.vmem (!%p1104_p3), [#allocation2], %s652_s11 }
  0x4e   : > { %922 = dma.done.wait (%p1046_p8), %s259_s23, 128  }
  0x4f   : > { %924 = vsyncadd (%p1046_p8), %s259_s23, 4294967168  ;;  %s267_s8 = sand.u32 1, %s1026_s21   ;;  %s1146_s22 = sshll.u32 %s1136_s10, 4 }
  0x50   : > { %s268_s13 = scalar_lea.sflag [#allocation6], %s267_s8  ;;  %s271_s25 = scalar_lea.vmem [#allocation5], %s1146_s22 }
  0x51   : > { %926 = dma.done.wait (%p1046_p8), %s268_s13, 512  }
  0x52   : > { %928 = vsyncadd (%p1046_p8), %s268_s13, 4294966784  ;;  %v964_v0 = vmov 0.0   ;;  %vm965_vm0 = vmmov 0   ;;  %v770_v1 = vld [vmem:[%s262_s7] sm:$0xff]   ;;  %v322_v2 = vld [vmem:[%s271_s25] sm:$0xff]  ;;  %s280_s21 = scalar_lea.vmem [#allocation7], %s1146_s22 }
  0x53   : > { %675 = vmatprep.subr.bf16.mxu0 %v964_v0  ;;  %681 = vmatprep.subr.bf16.mxu1 %v964_v0  ;;  %v323_v3 = vld [vmem:[%s271_s25 + $0x8] sm:$0xff]  ;;  %v400_v4 = vld [vmem:[%s280_s21] sm:$0xff]  ;;  %vm331_vm1 = vcmask 130048   ;;  %v966_v8 = vmov 32   ;;  %s314_s24 = scalar_lea.vmem [#allocation8], %s1146_s22  ;;  %s670_s1 = sshll.u32 %s947_s18, 8 }
  0x54   : > { %677 = vmatprep.mubr.msk.bf16.mxu0 %vm965_vm0, %v964_v0  ;;  %683 = vmatprep.mubr.msk.bf16.mxu1 %vm965_vm0, %v964_v0  ;;  %v324_v5 = vpack.c.bf16 %v323_v3, %v322_v2  ;;  %v401_v6 = vld [vmem:[%s280_s21 + $0x8] sm:$0xff]  ;;  %v658_v25 = vld [vmem:[%s1215_s3] ss:$0 sm:$0xff]  ;;  %s505_s29 = sshll.u32 %s314_s24, 4  ;;  %s1164_s2 = scalar_lea.hbm %s1216_s4, %s670_s1  ;;  %s1159_s29 = int_to_ptr.vmem [resolvable:$true] %s505_s29 }
  0x55   : > { %676 = vmatpush3.bf16.msra.mxu0 %v770_v1  ;;  %682 = vmatpush3.bf16.msra.mxu1 %v770_v1  ;;  %v402_v7 = vpack.c.bf16 %v401_v6, %v400_v4  ;;  %s490_s12 = scalar_lea.sflag [#allocation4], %s1136_s10  ;;  %s871_s14 = scalar_lea.vmem %s1159_s29, 256 }
  0x56   : > { %769 = vset.pattern.permute.xlu1 %v966_v8  ;;  %768 = vset.pattern.permute.xlu0 %v966_v8  ;;  %p872_p8 = scmp.ne.s32.totalorder %s1159_s29, %s871_s14  ;;  %s967_s18 = smov [#allocation8]  }
  0x57   : > { %s875_s9 = sshll.u32 %s967_s18, 4  ;;  %s876_s9 = int_to_ptr.vmem [resolvable:$false] %s875_s9 }
  0x58   : > { %678 = vmatmul.mubr.msk.bf16.vlgmr.msra.gmra.mxu0 %vm331_vm1, %v324_v5  ;;  %684 = vmatmul.mubr.msk.bf16.vlgmr.msra.gmra.mxu1 %vm331_vm1, %v402_v7  ;;  %p873_p12 = pnand %p872_p8, %p1050_p9  ;;  %s877_s11 = scalar_lea.vmem %s876_s9, 512 }
  0x59   : > { %p878_p1 = scmp.lt.s32.totalorder %s1159_s29, %s876_s9  ;;  %p879_p3 = scmp.lt.s32.totalorder %s877_s11, %s871_s14 }
  0x5a   : > { %p874_p0 = pneg %p873_p12 }
  0x5b   : > { %p880_p2 = por %p879_p3, %p878_p1 }
  0x5d   : > { %p881_p4 = pnand %p880_p2, %p874_p0 }
 0x118   : > { %v369_v9 = vpop.f32.mrf.mxu0  ;;  %v440_v10 = vpop.f32.mrf.mxu1 }
 0x119   : > { %v376_v11 = vadd.f32 1.0, %v369_v9  ;;  %v447_v12 = vadd.f32 1.0, %v440_v10 }
 0x11a   : > { %v679_v13 = vpop.f32.mrf.mxu0  ;;  %v685_v14 = vpop.f32.mrf.mxu1 }
 0x11b   : > { %771 = vrcp.f32 %v376_v11 }
 0x11c   : > { %773 = vrcp.f32 %v447_v12  ;;  %v372_v15 = vpop.f32.mrf.mxu0  ;;  %v443_v16 = vpop.f32.mrf.mxu1 }
 0x11d   : > { %v377_v17 = vadd.f32 1.0, %v372_v15  ;;  %v448_v18 = vadd.f32 1.0, %v443_v16 }
 0x11e   : > { %v686_v19 = vpop.f32.mrf.mxu1  ;;  %v680_v20 = vpop.f32.mrf.mxu0 }
 0x11f   : > { %775 = vrcp.f32 %v377_v17 }
 0x120   : > { %777 = vrcp.f32 %v448_v18 }
 0x128   : > { %v772_v21 = vpop.eup %771 }
 0x129   : > { %v774_v22 = vpop.eup %773  ;;  %382 = vperm.xlu1 %769, %v772_v21  }
 0x12a   : > { %453 = vperm.xlu0 %768, %v774_v22  }
 0x12c   : > { %v776_v23 = vpop.eup %775 }
 0x12d   : > { %v778_v24 = vpop.eup %777  ;;  %387 = vperm.xlu1 %769, %v776_v23  }
 0x12e   : > { %458 = vperm.xlu0 %768, %v778_v24  }
 0x1a4   : > { %v383_v37 = vpop.permute.xlu1 %382 }
 0x1a5   : > { %v454_v26 = vpop.permute.xlu0 %453  ;;  %v390_v39 = vmul.f32 %v383_v37, %v369_v9 }
 0x1a6   : > { %v461_v27 = vmul.f32 %v454_v26, %v440_v10 }
 0x1a7   : > { %v398_v41 = vadd.f32 %v658_v25, %v390_v39 }
 0x1a8   : > { %v463_v28 = vadd.f32 %v658_v25, %v461_v27  ;;  %v388_v40 = vpop.permute.xlu1 %387 }
 0x1a9   : > { %v459_v29 = vpop.permute.xlu0 %458  ;;  %v391_v42 = vmul.f32 %v388_v40, %v372_v15 }
 0x1aa   : > { %v660_v30 = vmul.f32 -1.442695, %v463_v28  ;;  %v462_v31 = vmul.f32 %v459_v29, %v443_v16  ;;  %v479_v45 = vsub.f32 %v463_v28, %v398_v41 }
 0x1ab   : > { %v399_v46 = vadd.f32 %v658_v25, %v391_v42 }
 0x1ac   : > { %779 = vpow2.f32 %v660_v30  ;;  %v464_v32 = vadd.f32 %v658_v25, %v462_v31 }
 0x1ae   : > { %v661_v33 = vmul.f32 -1.442695, %v464_v32  ;;  %v480_v51 = vsub.f32 %v464_v32, %v399_v46 }
 0x1b0   : > { %781 = vpow2.f32 %v661_v33 }
 0x1b9   : > { %v780_v34 = vpop.eup %779 }
 0x1ba   : > { %v471_v35 = vadd.f32 1.0, %v780_v34 }
 0x1bc   : > { %783 = vrcp.f32 %v471_v35 }
 0x1bd   : > { %v782_v36 = vpop.eup %781 }
 0x1be   : > { %v472_v38 = vadd.f32 1.0, %v782_v36 }
 0x1c0   : > { %785 = vrcp.f32 %v472_v38 }
 0x1c9   : > { %v784_v43 = vpop.eup %783 }
 0x1ca   : > { %v477_v44 = vmul.f32 0.2, %v784_v43 }
 0x1cc   : > { %v481_v47 = vmul.f32 %v479_v45, %v477_v44 }
 0x1cd   : > { %v786_v48 = vpop.eup %785 }
 0x1ce   : > { %v483_v49 = vadd.f32 %v481_v47, %v398_v41  ;;  %v478_v50 = vmul.f32 0.2, %v786_v48 }
 0x1d0   : > { %v485_v52 = vmax.f32 %v483_v49, 0.0  ;;  %v482_v53 = vmul.f32 %v480_v51, %v478_v50 }
 0x1d2   : > { %487 = vst [vmem:[%s314_s24] sm:$0xff] %v485_v52  ;;  %v484_v54 = vadd.f32 %v482_v53, %v399_v46 }
 0x1d4   : > { %v486_v55 = vmax.f32 %v484_v54, 0.0 }
 0x1d6   : > { %488 = vst [vmem:[%s314_s24 + $0x8] sm:$0xff] %v486_v55 }
 0x1d7   : > { %884 = shalt.err (!%p881_p4)
}
 0x1d8   : > { %s885_s23 = scalar_lea.hbm %s1164_s2, 256  ;;  %s889_s22 = scalar_lea.hbm %s1216_s4, 512 }
 0x1d9   : > { %p886_p5 = scmp.ne.s32.totalorder %s1164_s2, %s885_s23  ;;  %p890_p10 = scmp.lt.s32.totalorder %s1164_s2, %s1216_s4 }
 0x1da   : > { %p891_p13 = scmp.lt.s32.totalorder %s889_s22, %s885_s23 }
 0x1db   : > { %p887_p6 = pnand %p886_p5, %p1050_p9 }
 0x1dc   : > { %p892_p8 = por %p891_p13, %p890_p10 }
 0x1dd   : > { %p888_p7 = pneg %p887_p6 }
 0x1df   : > { %p893_p12 = pnand %p892_p8, %p888_p7 }
 0x1e1   : > { %896 = shalt.err (!%p893_p12)
}
 0x1e2   : > { %s968_s21 = smov 128   ;;  %s969_s27 = smov 8  }
 0x1e3   : > { %693 = dma.vmem_to_hbm [thread:$0]  (%p1050_p9), %s1159_s29, 256, %s1164_s2, %s490_s12, %s968_s21, %s968_s21, %s969_s27  }
 0x1e4 PF: > { %s520_s26 = sand.u32 1, %s935_s15   ;;  %p1234_p0 = scmp.ge.s32.totalorder %s955_s20, 2 }
 0x1e5   : > { %s521_s24 = scalar_lea.sflag [#allocation4], %s520_s26 }
 0x1e6   : > { %p706_p1 = pnand %p1234_p0, %p1057_p11 }
 0x1e8   : > { %p707_p3 = pneg %p706_p1 }
 0x1ea   : > { %930 = dma.done.wait (%p707_p3), %s521_s24, 256  }
 0x1eb   : > { %932 = vsyncadd (%p707_p3), %s521_s24, 4294967040  ;;  %s23_s20 = sadd.s32 1, %s955_s20   ;;  %s1235_s28 = sld [smem:[#allocation13_spill]] }
 0x1ec   : > { %p20_p2 = scmp.ge.s32.totalorder %s23_s20, 4   ;;  %s1236_s10 = sld [smem:[#allocation12_spill]] }
 0x1ed   : > { %s1237_s15 = smov %s939_s16  ;;  %s1238_s16 = smov %s943_s17 }
 0x1ee   : > { %s1240_s18 = smov %s951_s19  ;;  %22 = sbr.rel (!%p20_p2) target bundleno = 11 (0xb), region = 105 }
 0x1f1   : > { %s1239_s17 = smov %s1235_s28 }
 0x1f2   : > { %s1241_s19 = smov %s1236_s10 }
 0x1f3   :  { %526 = vsyncpa [#allocation3], 1 }
 0x1f4   :  { %528 = vsyncpa [#allocation3 + $0x1], 1 }
 0x1f5   :  { %529 = vsyncpa [#allocation6], 1 }
 0x1f6   :  { %531 = vsyncpa [#allocation6 + $0x1], 1 }
 0x1f7   :  { %532 = vsyncpa [#allocation4], 1 }
 0x1f8   :  { %534 = vsyncpa [#allocation4 + $0x1], 1 }

</bundles_post_ra>
